<compile_context>
chip_gen: v7x
topology: tpu7x:2x2x1
jax: 0.10.0
libtpu: 0.0.40
codegen_flags: <defaults>
</compile_context>

<pallas_src>
import jax
import jax.numpy as jnp
from jax.experimental import pallas as pl
from jax.experimental.pallas import tpu as pltpu

NEG_BIG = 1e30


def _round_up(x, m):
    return ((x + m - 1) // m) * m


def pointer_kernel(x_ref, sp_ref, m_ref, w1i_ref, w2_ref, out_ref, logit_ref):
    # x_ref    : (Bb, T, D)  input block (bf16 or f32)
    # sp_ref   : (Bb, H)     state @ W1_state, precomputed outside (f32)
    # m_ref    : (Bb, T)     mask, lane-dense (f32)
    # w1i_ref  : (D, H)      W1 slice acting on the input part (x dtype)
    # w2_ref   : (1, H)      second linear weight (f32)
    # out_ref  : (Bb, D)     attention-weighted sum (f32)
    # logit_ref: (Bb, T)     masked logits, lane-dense (f32)
    Bb, T, D = x_ref.shape
    H = w1i_ref.shape[1]

    # Linear(D+Ds -> H) on cat([state, input]) == x @ W1_input + state @ W1_state.
    # The state part is hoisted outside; flatten (Bb, T) into the MXU M dim.
    # T is padded to a sublane-tile multiple, so both reshapes are layout no-ops.
    z = jnp.dot(x_ref[...].reshape(Bb * T, D), w1i_ref[...],
                preferred_element_type=jnp.float32)              # (Bb*T, H) f32
    h = jnp.tanh(z.reshape(Bb, T, H) + sp_ref[...][:, None, :])  # (Bb, T, H) f32

    # Linear(H -> 1): multiply + lane reduction over H (H sits on the lane axis).
    score = jnp.sum(h * w2_ref[...], axis=-1)                    # (Bb, T) f32

    # Masked logits, stored lane-dense.
    logit = score - NEG_BIG * (1.0 - m_ref[...])                 # (Bb, T) f32
    logit_ref[...] = logit

    # Softmax over T (the lane axis), all f32.
    mx = jnp.max(logit, axis=-1, keepdims=True)                  # (Bb, 1)
    e = jnp.exp(logit - mx)                                      # (Bb, T)
    att = e * pl.reciprocal(jnp.sum(e, axis=-1, keepdims=True), approx=True)

    # Attention-weighted sum over T as a batched contraction; re-read x_ref
    # instead of keeping the big x value live across the softmax section.
    att3 = att.astype(x_ref.dtype)[:, None, :]                   # (Bb, 1, T)
    out = jnp.einsum('bqt,btd->bqd', att3, x_ref[...],
                     preferred_element_type=jnp.float32)         # (Bb, 1, D)
    out_ref[...] = out[:, 0, :]


def _choose_batch_block(B, T, D, H, x_bytes):
    """Pick the batch block Bb and the padded batch size Bp."""
    if B <= 8:
        # Tiny batch: a single whole-batch block (block dim == full dim is
        # always tile-legal, even when not a multiple of 8).
        return B, B
    # Per-batch-row VMEM working set: double-buffered x block + f32 z/h
    # intermediates + the small per-row streams (sp, mask, out, logit).
    per_row = (2 * T * D * x_bytes
               + 2 * T * H * 4
               + 2 * (H + D + 2 * T) * 4)
    budget = 12 * 1024 * 1024          # conservative: fits v7x scoped VMEM
    bb = max(8, (budget // max(per_row, 1)) // 8 * 8)
    bb = min(bb, _round_up(B, 8))
    # v7x megacore: keep >= 2 grid steps when the batch allows it so the
    # "parallel" grid axis can be sharded across both TensorCores.
    while bb > 8 and _round_up(B, bb) // bb < 2:
        bb = max(8, (bb // 2) // 8 * 8)
    return bb, _round_up(B, bb)


def pointer_forward(inp, state, mask, w1, w2, *, use_bf16_matmul=True):
    """inp [B,T,D], state [B,Ds], mask [B,T]; w1 [H, Ds+D], w2 [1, H]."""
    B, T, D = inp.shape
    Ds = state.shape[1]
    H = w1.shape[0]
    assert w1.shape[1] == Ds + D, "W1 must act on cat([state, input], -1)"

    f32 = jnp.float32
    inp = inp.astype(f32)
    state = state.astype(f32)
    mask = mask.astype(f32)
    w1 = w1.astype(f32)
    w2 = w2.astype(f32)

    # PyTorch Linear computes y = x @ W.T; cat order is [state, input], so the
    # first Ds columns of W1 act on state, the rest on input.
    w1_t = jnp.transpose(w1)                  # (Ds + D, H)
    w1s = w1_t[:Ds]                           # (Ds, H)
    w1i = w1_t[Ds:]                           # (D, H)

    # Hoist the state projection (plain XLA GEMM) out of the kernel.
    state_proj = jnp.dot(state, w1s)          # (B, H) f32

    # MXU inputs in bf16 (halves the dominant HBM stream); everything touching
    # the mask / logits / softmax stays f32.
    x_dtype = jnp.bfloat16 if use_bf16_matmul else f32
    x = inp.astype(x_dtype)
    w1i = w1i.astype(x_dtype)
    x_bytes = jnp.dtype(x_dtype).itemsize

    # Pad T to a sublane-tile multiple so the in-kernel (Bb,T,D)<->(Bb*T,D)
    # reshapes are free; padded positions carry x=0 / mask=0 and are sliced
    # off below.
    # TODO(synk): a fully-masked row softmaxes uniformly over T_pad instead of
    # T; that degenerate case does not occur for valid pointer masks.
    t_mult = 16 if use_bf16_matmul else 8
    Tp = _round_up(T, t_mult)
    if Tp != T:
        x = jnp.pad(x, ((0, 0), (0, Tp - T), (0, 0)))
        mask = jnp.pad(mask, ((0, 0), (0, Tp - T)))

    # Batch block: as large as the VMEM budget allows; pad B to a multiple.
    Bb, Bp = _choose_batch_block(B, Tp, D, H, x_bytes)
    if Bp != B:
        x = jnp.pad(x, ((0, Bp - B), (0, 0), (0, 0)))
        mask = jnp.pad(mask, ((0, Bp - B), (0, 0)))
        state_proj = jnp.pad(state_proj, ((0, Bp - B), (0, 0)))
    grid = (Bp // Bb,)

    # Explicit VMEM limit, re-derived for v7x's smaller VMEM (harmless on
    # v5e/v6e whose physical VMEM is 128 MiB).
    est = (2 * Bb * Tp * D * x_bytes
           + 3 * Bb * Tp * H * 4
           + 2 * Bb * (H + D + 2 * Tp) * 4
           + 2 * (D * H * x_bytes + 8 * H * 4))
    vmem_limit = int(min(max(2 * est, 32 * 1024 * 1024), 48 * 1024 * 1024))

    cost = pl.CostEstimate(
        flops=2 * Bp * Tp * H * (D + 1) + 2 * Bp * Tp * D + 6 * Bp * Tp,
        transcendentals=Bp * Tp * (H + 1),
        bytes_accessed=(Bp * Tp * D * x_bytes + D * H * x_bytes
                        + 4 * (Bp * H + 2 * Bp * Tp + H + Bp * D)),
    )

    out, logit = pl.pallas_call(
        pointer_kernel,
        out_shape=(
            jax.ShapeDtypeStruct((Bp, D), f32),
            jax.ShapeDtypeStruct((Bp, Tp), f32),
        ),
        grid=grid,
        in_specs=[
            pl.BlockSpec((Bb, Tp, D), lambda b: (b, 0, 0)),
            pl.BlockSpec((Bb, H), lambda b: (b, 0)),
            pl.BlockSpec((Bb, Tp), lambda b: (b, 0)),
            pl.BlockSpec((D, H), lambda b: (0, 0)),
            pl.BlockSpec((1, H), lambda b: (0, 0)),
        ],
        out_specs=(
            pl.BlockSpec((Bb, D), lambda b: (b, 0)),
            pl.BlockSpec((Bb, Tp), lambda b: (b, 0)),
        ),
        compiler_params=pltpu.CompilerParams(
            dimension_semantics=("parallel",),
            vmem_limit_bytes=vmem_limit),
        cost_estimate=cost,
    )(x, state_proj, mask, w1i, w2)

    return out[:B], logit[:B, :T]


def pointer_reference(inp, state, mask, w1, w2):
    """Pure-JAX mirror of the PyTorch forward, for verification."""
    st = jnp.broadcast_to(state[:, None, :], inp.shape)
    cat = jnp.concatenate([st, inp], axis=2)
    h = jnp.tanh(cat @ w1.T)
    att = h @ w2.T                                  # (B, T, 1)
    logit = att - NEG_BIG * (1.0 - mask[:, :, None])
    sm = jax.nn.softmax(logit, axis=1)
    return (inp * sm).sum(1), logit[..., 0]


if __name__ == "__main__":
    def _check(B, T, input_size, state_size, hidden_size, seed):
        key = jax.random.PRNGKey(seed)
        k1, k2, k3, k4, k5 = jax.random.split(key, 5)
        inp = jax.random.normal(k1, (B, T, input_size), dtype=jnp.float32)
        state = jax.random.normal(k2, (B, state_size), dtype=jnp.float32)
        # valid-length style mask; every row has at least one valid position
        lens = jax.random.randint(k5, (B,), 1, T + 1)
        mask = (jnp.arange(T)[None, :] < lens[:, None]).astype(jnp.float32)

        # deterministic Xavier-uniform-like init for the two Linear weights
        fan_in1 = input_size + state_size
        bound1 = (6.0 / (fan_in1 + hidden_size)) ** 0.5
        w1 = jax.random.uniform(k3, (hidden_size, fan_in1), jnp.float32,
                                -bound1, bound1)
        bound2 = (6.0 / (hidden_size + 1)) ** 0.5
        w2 = jax.random.uniform(k4, (1, hidden_size), jnp.float32,
                                -bound2, bound2)

        out, logit = pointer_forward(inp, state, mask, w1, w2)
        jax.block_until_ready((out, logit))

        out_ref, logit_ref = pointer_reference(inp, state, mask, w1, w2)
        assert out.shape == (B, input_size) and logit.shape == (B, T)
        # bf16 MXU inputs -> relaxed tolerance (mask/logit/softmax stay f32)
        assert jnp.allclose(out, out_ref, rtol=3e-2, atol=3e-2), (
            float(jnp.max(jnp.abs(out - out_ref))))
        assert jnp.allclose(logit, logit_ref, rtol=3e-2, atol=3e-2), (
            float(jnp.max(jnp.abs(logit - logit_ref))))

    # Small shape matching the module's intent (state_size == input_size).
    _check(B=2, T=8, input_size=32, state_size=32, hidden_size=32, seed=0)
    # Exercise T padding, batch blocking (Bb=8, 2 grid steps) and remainder.
    _check(B=12, T=12, input_size=32, state_size=32, hidden_size=48, seed=1)

    print("KERNEL_OK")
</pallas_src>

<mosaic_0001>
module attributes {stable_mosaic.version = 11 : i64} {
  func.func @pointer_kernel(%arg0: i32, %arg1: memref<2x16x32xbf16, #tpu.memory_space<vmem>>, %arg2: memref<2x32xf32, #tpu.memory_space<vmem>>, %arg3: memref<2x16xf32, #tpu.memory_space<vmem>>, %arg4: memref<32x32xbf16, #tpu.memory_space<vmem>>, %arg5: memref<1x32xf32, #tpu.memory_space<vmem>>, %arg6: memref<2x32xf32, #tpu.memory_space<vmem>>, %arg7: memref<2x16xf32, #tpu.memory_space<vmem>>) attributes {dimension_semantics = [#tpu.dimension_semantics<parallel>], iteration_bounds = array<i64: 1>, scalar_prefetch = 0 : i64, scratch_operands = 0 : i64, tpu.core_type = #tpu.core_type<tc>, window_params = [{transform_indices = @transform_0, window_bounds = array<i64: 2, 16, 32>}, {transform_indices = @transform_1, window_bounds = array<i64: 2, 32>}, {transform_indices = @transform_2, window_bounds = array<i64: 2, 16>}, {pipeline_mode = #tpu.pipeline_mode<synchronous>, transform_indices = @transform_3, window_bounds = array<i64: 32, 32>}, {pipeline_mode = #tpu.pipeline_mode<synchronous>, transform_indices = @transform_4, window_bounds = array<i64: 1, 32>}, {transform_indices = @transform_5, window_bounds = array<i64: 2, 32>}, {transform_indices = @transform_6, window_bounds = array<i64: 2, 16>}]} {
    %c0 = arith.constant 0 : index
    %c0_0 = arith.constant 0 : index
    %c0_1 = arith.constant 0 : index
    %0 = vector.load %arg1[%c0, %c0_0, %c0_1] : memref<2x16x32xbf16, #tpu.memory_space<vmem>>, vector<2x16x32xbf16>
    %1 = vector.shape_cast %0 : vector<2x16x32xbf16> to vector<32x32xbf16>
    %c0_2 = arith.constant 0 : index
    %c0_3 = arith.constant 0 : index
    %2 = vector.load %arg4[%c0_2, %c0_3] : memref<32x32xbf16, #tpu.memory_space<vmem>>, vector<32x32xbf16>
    %cst = arith.constant dense<0.000000e+00> : vector<32x32xf32>
    %3 = tpu.matmul %1, %2, %cst {dimension_numbers = #tpu.dot_dimension_numbers<[1], [0], [0], [1], [0, 0, 1, 1], [], []>} : vector<32x32xbf16>, vector<32x32xbf16>, vector<32x32xf32> -> vector<32x32xf32>
    %4 = vector.shape_cast %3 : vector<32x32xf32> to vector<2x16x32xf32>
    %c0_4 = arith.constant 0 : index
    %c0_5 = arith.constant 0 : index
    %5 = vector.load %arg2[%c0_4, %c0_5] : memref<2x32xf32, #tpu.memory_space<vmem>>, vector<2x32xf32>
    %6 = vector.shape_cast %5 : vector<2x32xf32> to vector<2x1x32xf32>
    %7 = vector.broadcast %6 : vector<2x1x32xf32> to vector<2x16x32xf32>
    %8 = arith.addf %4, %7 : vector<2x16x32xf32>
    %9 = math.tanh %8 : vector<2x16x32xf32>
    %c0_6 = arith.constant 0 : index
    %c0_7 = arith.constant 0 : index
    %10 = vector.load %arg5[%c0_6, %c0_7] : memref<1x32xf32, #tpu.memory_space<vmem>>, vector<1x32xf32>
    %11 = vector.shape_cast %10 : vector<1x32xf32> to vector<1x1x32xf32>
    %12 = vector.broadcast %11 : vector<1x1x32xf32> to vector<2x16x32xf32>
    %13 = arith.mulf %9, %12 : vector<2x16x32xf32>
    %cst_8 = arith.constant dense<0.000000e+00> : vector<2x16xf32>
    %14 = vector.multi_reduction <add>, %13, %cst_8 [2] : vector<2x16x32xf32> to vector<2x16xf32>
    %c0_9 = arith.constant 0 : index
    %c0_10 = arith.constant 0 : index
    %15 = vector.load %arg3[%c0_9, %c0_10] : memref<2x16xf32, #tpu.memory_space<vmem>>, vector<2x16xf32>
    %cst_11 = arith.constant 1.000000e+00 : f32
    %16 = vector.broadcast %cst_11 : f32 to vector<2x16xf32>
    %17 = arith.subf %16, %15 : vector<2x16xf32>
    %cst_12 = arith.constant 1.000000e+30 : f32
    %18 = vector.broadcast %cst_12 : f32 to vector<2x16xf32>
    %19 = arith.mulf %18, %17 : vector<2x16xf32>
    %20 = arith.subf %14, %19 : vector<2x16xf32>
    %c0_13 = arith.constant 0 : index
    %c0_14 = arith.constant 0 : index
    %21 = vector.load %arg7[%c0_13, %c0_14] : memref<2x16xf32, #tpu.memory_space<vmem>>, vector<2x16xf32>
    tpu.vector_store %arg7[%c0_13, %c0_14], %20 {strides = array<i32>} : memref<2x16xf32, #tpu.memory_space<vmem>>, vector<2x16xf32>,
    %cst_15 = arith.constant dense<0xFF800000> : vector<2xf32>
    %22 = vector.multi_reduction <maximumf>, %20, %cst_15 [1] : vector<2x16xf32> to vector<2xf32>
    %23 = vector.shape_cast %22 : vector<2xf32> to vector<2x1xf32>
    %24 = vector.broadcast %23 : vector<2x1xf32> to vector<2x16xf32>
    %25 = arith.subf %20, %24 : vector<2x16xf32>
    %26 = math.exp %25 : vector<2x16xf32>
    %cst_16 = arith.constant dense<0.000000e+00> : vector<2xf32>
    %27 = vector.multi_reduction <add>, %26, %cst_16 [1] : vector<2x16xf32> to vector<2xf32>
    %28 = vector.shape_cast %27 : vector<2xf32> to vector<2x1xf32>
    %29 = tpu.reciprocal %28 {approx = true} : vector<2x1xf32> -> vector<2x1xf32>
    %30 = vector.broadcast %29 : vector<2x1xf32> to vector<2x16xf32>
    %31 = arith.mulf %26, %30 : vector<2x16xf32>
    %32 = arith.truncf %31 : vector<2x16xf32> to vector<2x16xbf16>
    %33 = vector.shape_cast %32 : vector<2x16xbf16> to vector<2x1x16xbf16>
    %c0_17 = arith.constant 0 : index
    %c0_18 = arith.constant 0 : index
    %c0_19 = arith.constant 0 : index
    %34 = vector.load %arg1[%c0_17, %c0_18, %c0_19] : memref<2x16x32xbf16, #tpu.memory_space<vmem>>, vector<2x16x32xbf16>
    "tpu.trace_start"() <{level = 10 : i32, message = "bqt,btd->bqd"}> : () -> ()
    %cst_20 = arith.constant dense<0.000000e+00> : vector<2x1x32xf32>
    %35 = tpu.matmul %33, %34, %cst_20 {dimension_numbers = #tpu.dot_dimension_numbers<[2], [1], [1], [2], [0, 0, 0, 1, 1, 2], [0], [0]>} : vector<2x1x16xbf16>, vector<2x16x32xbf16>, vector<2x1x32xf32> -> vector<2x1x32xf32>
    "tpu.trace_stop"() : () -> ()
    %36 = vector.shape_cast %35 : vector<2x1x32xf32> to vector<2x32xf32>
    %c0_21 = arith.constant 0 : index
    %c0_22 = arith.constant 0 : index
    %37 = vector.load %arg6[%c0_21, %c0_22] : memref<2x32xf32, #tpu.memory_space<vmem>>, vector<2x32xf32>
    tpu.vector_store %arg6[%c0_21, %c0_22], %36 {strides = array<i32>} : memref<2x32xf32, #tpu.memory_space<vmem>>, vector<2x32xf32>,
    return
  }
  func.func @transform_0(%arg0: i32) -> (i32, i32, i32) {
    %c0_i32 = arith.constant 0 : i32
    %c0_i32_0 = arith.constant 0 : i32
    %c0_i32_1 = arith.constant 0 : i32
    return %arg0, %c0_i32, %c0_i32_0 : i32, i32, i32
  }
  func.func @transform_1(%arg0: i32) -> (i32, i32) {
    %c0_i32 = arith.constant 0 : i32
    %c0_i32_0 = arith.constant 0 : i32
    return %arg0, %c0_i32 : i32, i32
  }
  func.func @transform_2(%arg0: i32) -> (i32, i32) {
    %c0_i32 = arith.constant 0 : i32
    %c0_i32_0 = arith.constant 0 : i32
    return %arg0, %c0_i32 : i32, i32
  }
  func.func @transform_3(%arg0: i32) -> (i32, i32) {
    %c0_i32 = arith.constant 0 : i32
    %c0_i32_0 = arith.constant 0 : i32
    %c0_i32_1 = arith.constant 0 : i32
    return %c0_i32, %c0_i32_0 : i32, i32
  }
  func.func @transform_4(%arg0: i32) -> (i32, i32) {
    %c0_i32 = arith.constant 0 : i32
    %c0_i32_0 = arith.constant 0 : i32
    %c0_i32_1 = arith.constant 0 : i32
    return %c0_i32, %c0_i32_0 : i32, i32
  }
  func.func @transform_5(%arg0: i32) -> (i32, i32) {
    %c0_i32 = arith.constant 0 : i32
    %c0_i32_0 = arith.constant 0 : i32
    return %arg0, %c0_i32 : i32, i32
  }
  func.func @transform_6(%arg0: i32) -> (i32, i32) {
    %c0_i32 = arith.constant 0 : i32
    %c0_i32_0 = arith.constant 0 : i32
    return %arg0, %c0_i32 : i32, i32
  }
}

</mosaic_0001>

<bundles_post_ra>
// kernel: tpu_custom_call.1
= control target key start
LH: loop header
LB: loop body
LE: loop exit
PB: predicated region body
PF: predicated region fallthrough
CT: control target
= control target key end

     0   :  { %12 = vsyncpa [#allocation3], 0  ;;  %s873_s0 = inlined_call_operand.hbm [shape: bf16[2,16,32], index: 0, kind: input, shape index: {}]   ;;  %s874_s1 = inlined_call_operand.vmem [shape: f32[2,32], index: 1, kind: input, shape index: {}]   ;;  %s875_s2 = inlined_call_operand.vmem [shape: f32[2,16], index: 2, kind: input, shape index: {}]   ;;  %s876_s3 = inlined_call_operand.hbm [shape: bf16[32,32], index: 3, kind: input, shape index: {}]   ;;  %s877_s4 = inlined_call_operand.vmem [shape: f32[1,32], index: 4, kind: input, shape index: {}]   ;;  %s878_s5 = inlined_call_operand.hbm [shape: f32[2,32], index: 5, kind: output, shape index: {0}]   ;;  %s879_s6 = inlined_call_operand.hbm [shape: f32[2,16], index: 6, kind: output, shape index: {1}]  }
   0x1   :  { %13 = vsyncpa [#allocation6], 0 }
   0x2   :  { %14 = vsyncpa [#allocation4], 0 }
   0x3   :  { %15 = vsyncpa [#allocation9], 0  ;;  %s714_s21 = smov [#allocation2]   ;;  %s618_s25 = scalar_lea.hbm %s873_s0, 256 }
   0x4   :  { %s21_s22 = sshll.u32 %s714_s21, 4  ;;  %p619_p0 = scmp.ne.s32.totalorder %s873_s0, %s618_s25  ;;  %s22_s22 = int_to_ptr.vmem [resolvable:$true] %s21_s22 }
   0x5   :  { %p622_p1 = scmp.lt.u32.totalorder %s618_s25, %s873_s0 }
   0x7   :  { %p624_p2 = pnand %p622_p1, %p619_p0 }
   0x9   :  { %627 = shalt.err (!%p624_p2)
}
   0xa   :  { %s628_s30 = scalar_lea.vmem %s22_s22, 256  ;;  %p633_p4 = scmp.lt.s32.totalorder %s22_s22, %s22_s22 }
   0xb   :  { %p629_p3 = scmp.ne.s32.totalorder %s22_s22, %s628_s30  ;;  %p634_p5 = scmp.lt.s32.totalorder %s628_s30, %s628_s30 }
   0xd   :  { %p635_p6 = por %p634_p5, %p633_p4 }
   0xf   :  { %p636_p7 = pnand %p635_p6, %p629_p3 }
  0x11   :  { %639 = shalt.err (!%p636_p7)
}
  0x12   :  { %s715_s7 = smov 64   ;;  %s716_s8 = smov 4  }
  0x13   :  { %27 = dma.hbm_to_vmem [thread:$0]  %s873_s0, 256, %s22_s22, [#allocation3], %s715_s7, %s715_s7, %s716_s8  }
  0x14   :  { %s717_s11 = smov [#allocation5]   ;;  %s640_s15 = scalar_lea.hbm %s876_s3, 256 }
  0x15   :  { %s37_s12 = sshll.u32 %s717_s11, 4  ;;  %p641_p8 = scmp.ne.s32.totalorder %s876_s3, %s640_s15  ;;  %s38_s12 = int_to_ptr.vmem [resolvable:$true] %s37_s12 }
  0x16   :  { %p644_p9 = scmp.lt.u32.totalorder %s640_s15, %s876_s3 }
  0x18   :  { %p646_p10 = pnand %p644_p9, %p641_p8 }
  0x1a   :  { %649 = shalt.err (!%p646_p10)
}
  0x1b   :  { %s650_s20 = scalar_lea.vmem %s38_s12, 256  ;;  %p655_p12 = scmp.lt.s32.totalorder %s38_s12, %s38_s12 }
  0x1c   :  { %p651_p11 = scmp.ne.s32.totalorder %s38_s12, %s650_s20  ;;  %p656_p13 = scmp.lt.s32.totalorder %s650_s20, %s650_s20 }
  0x1e   :  { %p657_p0 = por %p656_p13, %p655_p12 }
  0x20   :  { %p658_p1 = pnand %p657_p0, %p651_p11 }
  0x22   :  { %661 = shalt.err (!%p658_p1)
}
  0x23   :  { %43 = dma.hbm_to_vmem [thread:$0]  %s876_s3, 256, %s38_s12, [#allocation6], %s715_s7, %s715_s7, %s716_s8  }
  0x24   :  { %706 = dma.done.wait [#allocation3], 256  }
  0x25   :  { %707 = vsyncadd [#allocation3], 4294967040 }
  0x26   :  { %708 = dma.done.wait [#allocation6], 256  }
  0x27   :  { %709 = vsyncadd [#allocation6], 4294967040  ;;  %v594_v0 = vld [vmem:[#allocation5] sm:$0xff]   ;;  %v595_v1 = vld [vmem:[#allocation5 + $0x8] sm:$0xff]   ;;  %vm83_vm0 = vcmask 261120   ;;  %v152_v6 = vlaneseq  ;;  %v719_v44 = vmov 0  }
  0x28   :  { %562 = vmatprep.subr.bf16.mxu0 %v594_v0  ;;  %v596_v2 = vld [vmem:[#allocation2] sm:$0xff]   ;;  %v597_v3 = vld [vmem:[#allocation2 + $0x8] sm:$0xff]   ;;  %v718_v4 = vmov 1966171168   ;;  %593 = vset.pattern.permute.xlu1 %v719_v44  ;;  %vm265_vm1 = vcmask 130112   ;;  %vm276_vm2 = vcmask 1041409  }
  0x29   :  { %563 = vmatpush3.bf16.msra.mxu0 %v594_v0  ;;  %566 = vmatprep.mubr.msk.bf16.mxu0 %vm83_vm0, %v596_v2  ;;  %v150_v5 = vunpack.c.l.s4 %v718_v4  ;;  %v786_v8 = vshrl.u32 %v152_v6, 7  ;;  %v548_v9 = vld.sshfl [vmem:[%s874_s1] sm:$0x11 pattern:$0x75316420]  ;;  %v255_v57 = vand.u32 127, %v152_v6 }
  0x2a   :  { %564 = vmatprep.subr.bf16.mxu0 %v595_v1  ;;  %v148_v10 = vcombine.high %v548_v9, %v548_v9  ;;  %v549_v25 = vld [vmem:[%s877_s4] ss:$0 sm:$0xff]  ;;  %592 = vset.pattern.permute.xlu0 %v719_v44  ;;  %vm279_vm3 = vcmask 123904   ;;  %vm721_vm4 = vmmov 0   ;;  %vm393_vm5 = vcmask 130048  }
  0x2b   :  { %v151_v7 = vunpack.c.0.s8 %v150_v5  ;;  %v793_v13 = vsub.s32 0, %v786_v8  ;;  %v204_v38 = vld [vmem:[%s875_s2] sm:$0x3]  ;;  %v809_v42 = vsub.s32 1, %v786_v8  ;;  %v260_v58 = vadd.s32 4294967288, %v255_v57  ;;  %s722_s2 = smov [#allocation8]  }
  0x2c   :  { %v205_v39 = vsub.f32 1.0, %v204_v38  ;;  %v817_v61 = vsub.s32 %v255_v57, %v786_v8  ;;  %v599_v57 = vld [vmem:[#allocation2 + $0x8] sm:$0xff]   ;;  %s528_s25 = sshll.u32 %s722_s2, 4  ;;  %s529_s25 = int_to_ptr.vmem [resolvable:$true] %s528_s25 }
  0x2d   :  { %565 = vmatpush3.bf16.msra.mxu0 %v595_v1  ;;  %v154_v11 = vsub.s32 %v151_v7, %v786_v8  ;;  %v814_v60 = vsub.s32 %v260_v58, %v786_v8  ;;  %s662_s26 = scalar_lea.vmem %s529_s25, 32  ;;  %p667_p3 = scmp.lt.s32.totalorder %s529_s25, %s529_s25 }
  0x2e   :  { %v206_v40 = vmul.f32 1e+30, %v205_v39  ;;  %p663_p2 = scmp.ne.s32.totalorder %s529_s25, %s662_s26  ;;  %p668_p4 = scmp.lt.s32.totalorder %s662_s26, %s662_s26 }
  0x2f   :  { %v162_v12 = vrot.slane %v148_v10, %v154_v11  ;;  %v155_v14 = vrot.slane %v548_v9, %v154_v11 }
  0x30   :  { %567 = vmatmul.mubr.msk.bf16.vlgmr.msra.gmra.mrb[0].mxu0 %vm83_vm0, %v597_v3  ;;  %v211_v41 = vrot.slane %v206_v40, %v793_v13  ;;  %v222_v43 = vrot.slane %v206_v40, %v809_v42  ;;  %p669_p5 = por %p668_p4, %p667_p3 }
  0x31   :  { %v170_v15 = vrot.slane %v162_v12, %v793_v13  ;;  %v166_v16 = vrot.slane %v155_v14, %v793_v13 }
  0x32   :  { %p670_p6 = pnand %p669_p5, %p663_p2 }
 0x103   :  { %v568_v17 = vpop.f32.mrb[0].mxu0 }
 0x104   :  { %v175_v18 = vadd.f32 %v568_v17, %v170_v15  ;;  %v124_v19 = vpop.f32.mrb[1].mxu0 }
 0x105   :  { %v173_v20 = vadd.f32 %v166_v16, %v124_v19  ;;  %v569_v21 = vpop.f32.mrb[2].mxu0 }
 0x106   :  { %600 = vtanh.f32 %v175_v18  ;;  %v176_v22 = vadd.f32 %v569_v21, %v170_v15  ;;  %v127_v23 = vpop.f32.mrb[3].mxu0 }
 0x107   :  { %602 = vtanh.f32 %v173_v20  ;;  %v174_v24 = vadd.f32 %v166_v16, %v127_v23 }
 0x108   :  { %604 = vtanh.f32 %v176_v22 }
 0x109   :  { %606 = vtanh.f32 %v174_v24 }
 0x110   :  { %v601_v26 = vpop.eup %600 }
 0x111   :  { %v603_v27 = vpop.eup %602  ;;  %v190_v28 = vmul.f32 %v601_v26, %v549_v25 }
 0x112   :  { %v605_v29 = vpop.eup %604  ;;  %v188_v30 = vmul.f32 %v603_v27, %v549_v25 }
 0x113   :  { %v607_v31 = vpop.eup %606  ;;  %v198_v32 = vsel %vm83_vm0, %v190_v28, 0.0  ;;  %v191_v33 = vmul.f32 %v605_v29, %v549_v25 }
 0x114   :  { %199 = vadd.xlane.f32.xlu1 %v198_v32  ;;  %v192_v34 = vsel %vm83_vm0, %v188_v30, 0.0  ;;  %v189_v35 = vmul.f32 %v607_v31, %v549_v25 }
 0x115   :  { %193 = vadd.xlane.f32.xlu0 %v192_v34  ;;  %v201_v36 = vsel %vm83_vm0, %v191_v33, 0.0 }
 0x116   :  { %v195_v37 = vsel %vm83_vm0, %v189_v35, 0.0 }
 0x118   :  { %202 = vadd.xlane.f32.xlu1 %v201_v36 }
 0x119   :  { %196 = vadd.xlane.f32.xlu0 %v195_v37 }
 0x129   :  { %217 = vbcast.lane.b32.xlu1 %v211_v41, 264 }
 0x12d   :  { %224 = vbcast.lane.b32.xlu1 %v222_v43, 256 }
 0x12f   :  { %213 = vbcast.lane.b32.xlu0 %v211_v41, 256 }
 0x131   :  { %228 = vbcast.lane.b32.xlu1 %v222_v43, 264 }
 0x1a1   :  { %v200_v45 = vpop.xlane.xlu1 %199 }
 0x1a2   :  { %v194_v46 = vpop.xlane.xlu0 %193 }
 0x1a5   :  { %v203_v47 = vpop.xlane.xlu1 %202 }
 0x1a6   :  { %v197_v48 = vpop.xlane.xlu0 %196 }
 0x1a9   :  { %v218_v49 = vpop.permute.xlu1 %217 }
 0x1aa   :  { %v235_v50 = vsub.f32 %v197_v48, %v218_v49  ;;  %v214_v51 = vpop.permute.xlu0 %213 }
 0x1ab   :  { %v234_v52 = vsub.f32 %v194_v46, %v214_v51  ;;  %v598_v51 = vld [vmem:[#allocation2] sm:$0xff]  }
 0x1ac   :  { %246 = vperm.xlu1 %593, %v235_v50  }
 0x1ad   :  { %v225_v53 = vpop.permute.xlu1 %224  ;;  %243 = vperm.xlu0 %592, %v234_v52  }
 0x1ae   :  { %v236_v54 = vsub.f32 %v200_v45, %v225_v53 }
 0x1b0   :  { %249 = vperm.xlu1 %593, %v236_v54  }
 0x1b1   :  { %v229_v55 = vpop.permute.xlu1 %228 }
 0x1b2   :  { %v237_v56 = vsub.f32 %v203_v47, %v229_v55 }
 0x1b4   :  { %252 = vperm.xlu0 %592, %v237_v56  }
 0x22b   :  { %v247_v59 = vpop.permute.xlu1 %246 }
 0x22c   :  { %v244_v62 = vpop.permute.xlu0 %243  ;;  %v264_v0 = vrot.slane %v247_v59, %v814_v60 }
 0x22d   :  { %v259_v1 = vrot.slane %v244_v62, %v817_v61 }
 0x22f   :  { %v250_v63 = vpop.permute.xlu1 %249  ;;  %v266_v5 = vsel %vm265_vm1, %v264_v0, %v259_v1 }
 0x230   :  { %v270_v3 = vrot.slane %v250_v63, %v817_v61 }
 0x233   :  { %v253_v2 = vpop.permute.xlu0 %252 }
 0x234   :  { %v274_v4 = vrot.slane %v253_v2, %v814_v60 }
 0x236   :  { %v275_v6 = vsel %vm265_vm1, %v274_v4, %v270_v3 }
 0x237   :  { %v277_v7 = vsel %vm276_vm2, %v275_v6, %v266_v5 }
 0x238   :  { %v281_v8 = vsel %vm279_vm3, %v277_v7, -inf  ;;  %280 = vst.msk [vmem:[#allocation8] sm:$0x3] %vm279_vm3, %v277_v7 }
 0x239   :  { %282 = vmax.xlane.f32.xlu1 %v281_v8 }
 0x2c6   :  { %v283_v9 = vpop.xlane.xlu1 %282 }
 0x2c7   :  { %v288_v10 = vrot.slane %v283_v9, %v793_v13  ;;  %v292_v11 = vrot.slane %v283_v9, %v809_v42 }
 0x2c9   :  { %v295_v12 = vsub.f32 %v234_v52, %v288_v10  ;;  %v296_v14 = vsub.f32 %v235_v50, %v288_v10  ;;  %v297_v16 = vsub.f32 %v236_v54, %v292_v11  ;;  %v298_v18 = vsub.f32 %v237_v56, %v292_v11 }
 0x2ca   :  { %v720_v52 = vmov 0.0  }
 0x2cb   :  { %v299_v15 = vmul.f32 1.442695, %v295_v12  ;;  %v301_v17 = vmul.f32 1.442695, %v296_v14  ;;  %v303_v19 = vmul.f32 1.442695, %v297_v16  ;;  %570 = vmatprep.subr.bf16.mxu1 %v720_v52  ;;  %572 = vmatprep.mubr.msk.bf16.mxu1 %vm721_vm4, %v720_v52 }
 0x2cc   :  { %v305_v20 = vmul.f32 1.442695, %v298_v18  ;;  %571 = vmatpush3.bf16.msra.mxu1 %v598_v51 }
 0x2cd   :  { %608 = vpow2.f32 %v299_v15  ;;  %576 = vmatprep.subr.bf16.mxu1 %v720_v52 }
 0x2ce   :  { %610 = vpow2.f32 %v301_v17 }
 0x2cf   :  { %612 = vpow2.f32 %v303_v19 }
 0x2d0   :  { %614 = vpow2.f32 %v305_v20 }
 0x2d7   :  { %v609_v21 = vpop.eup %608 }
 0x2d8   :  { %312 = vperm.xlu0 %592, %v609_v21   ;;  %v611_v22 = vpop.eup %610 }
 0x2d9   :  { %v613_v23 = vpop.eup %612 }
 0x2da   :  { %v615_v24 = vpop.eup %614 }
 0x2dc   :  { %315 = vperm.xlu0 %592, %v611_v22  }
 0x2e0   :  { %318 = vperm.xlu0 %592, %v613_v23  }
 0x2e4   :  { %321 = vperm.xlu0 %592, %v615_v24  }
 0x357   :  { %v313_v25 = vpop.permute.xlu0 %312 }
 0x358   :  { %v326_v30 = vrot.slane %v313_v25, %v817_v61 }
 0x35b   :  { %v316_v26 = vpop.permute.xlu0 %315 }
 0x35c   :  { %v330_v28 = vrot.slane %v316_v26, %v814_v60 }
 0x35e   :  { %v331_v33 = vsel %vm265_vm1, %v330_v28, %v326_v30 }
 0x35f   :  { %v319_v27 = vpop.permute.xlu0 %318 }
 0x360   :  { %v335_v31 = vrot.slane %v319_v27, %v817_v61 }
 0x363   :  { %v322_v29 = vpop.permute.xlu0 %321 }
 0x364   :  { %v339_v32 = vrot.slane %v322_v29, %v814_v60 }
 0x366   :  { %v340_v34 = vsel %vm265_vm1, %v339_v32, %v335_v31 }
 0x367   :  { %v341_v35 = vsel %vm276_vm2, %v340_v34, %v331_v33 }
 0x368   :  { %v343_v36 = vsel %vm279_vm3, %v341_v35, 0.0 }
 0x369   :  { %344 = vadd.xlane.f32.xlu0 %v343_v36 }
 0x3f6   :  { %v345_v37 = vpop.xlane.xlu0 %344 }
 0x3f7   :  { %616 = vrcp.f32 %v345_v37 }
 0x401   :  { %v617_v38 = vpop.eup %616 }
 0x402   :  { %v351_v39 = vrot.slane %v617_v38, %v793_v13  ;;  %v355_v40 = vrot.slane %v617_v38, %v809_v42 }
 0x404   :  { %v358_v41 = vmul.f32 %v609_v21, %v351_v39  ;;  %v359_v43 = vmul.f32 %v611_v22, %v351_v39  ;;  %v360_v44 = vmul.f32 %v613_v23, %v355_v40  ;;  %v361_v45 = vmul.f32 %v615_v24, %v355_v40 }
 0x406   :  { %v362_v46 = vpack.c.bf16 %v359_v43, %v358_v41  ;;  %v363_v49 = vpack.c.bf16 %v361_v45, %v360_v44 }
 0x408   :  { %v370_v47 = vunpack.c.h.b16 %v362_v46  ;;  %v369_v48 = vunpack.c.l.b16 %v362_v46  ;;  %v438_v50 = vunpack.c.l.b16 %v363_v49  ;;  %v439_v13 = vunpack.c.h.b16 %v363_v49 }
 0x40a   :  { %375 = vperm.xlu0 %592, %v370_v47   ;;  %372 = vperm.xlu1 %593, %v369_v48  }
 0x40e   :  { %441 = vperm.xlu1 %593, %v438_v50  }
 0x412   :  { %444 = vperm.xlu1 %593, %v439_v13  }
 0x489   :  { %v376_v42 = vpop.permute.xlu0 %375  ;;  %v373_v53 = vpop.permute.xlu1 %372 }
 0x48a   :  { %v384_v54 = vrot.slane %v376_v42, %v814_v60  ;;  %v380_v55 = vrot.slane %v373_v53, %v817_v61 }
 0x48c   :  { %v385_v56 = vsel %vm265_vm1, %v384_v54, %v380_v55 }
 0x48d   :  { %v386_v58 = vpack.c.b16 %v385_v56, %v385_v56  ;;  %v442_v59 = vpop.permute.xlu1 %441 }
 0x48e   :  { %v449_v63 = vrot.slane %v442_v59, %v817_v61 }
 0x48f   :  { %573 = vmatmul.mubr.msk.bf16.vlgmr.msra.gmra.mrb[0].mxu1 %vm393_vm5, %v386_v58 }
 0x490   :  { %577 = vmatpush3.bf16.msra.mxu1 %v599_v57  ;;  %578 = vmatprep.mubr.msk.bf16.mxu1 %vm721_vm4, %v720_v52 }
 0x491   :  { %v445_v62 = vpop.permute.xlu1 %444 }
 0x492   :  { %v453_v0 = vrot.slane %v445_v62, %v814_v60 }
 0x494   :  { %v454_v1 = vsel %vm265_vm1, %v453_v0, %v449_v63 }
 0x495   :  { %v455_v2 = vpack.c.b16 %v454_v1, %v454_v1 }
 0x497   :  { %579 = vmatmul.mubr.msk.bf16.vlgmr.msra.gmra.mrb[4].mxu1 %vm393_vm5, %v455_v2 }
 0x498   :  { %673 = shalt.err (!%p670_p6)
}
 0x499   :  { %s674_s29 = scalar_lea.hbm %s879_s6, 32 }
 0x49a   :  { %p675_p7 = scmp.ne.s32.totalorder %s879_s6, %s674_s29  ;;  %p678_p8 = scmp.lt.u32.totalorder %s674_s29, %s879_s6 }
 0x49c   :  { %p680_p9 = pnand %p678_p8, %p675_p7 }
 0x49e   :  { %683 = shalt.err (!%p680_p9)
}
 0x49f   :  { %531 = dma.vmem_to_hbm [thread:$0]  %s529_s25, 32, %s879_s6, [#allocation9]   ;;  %vm510_vm6 = vcmask 254976  }
 0x4a0   :  { %s723_s12 = smov [#allocation7]  }
 0x4a1   :  { %s518_s13 = sshll.u32 %s723_s12, 4  ;;  %s519_s13 = int_to_ptr.vmem [resolvable:$true] %s518_s13 }
 0x4a2   :  { %s684_s14 = scalar_lea.vmem %s519_s13, 32  ;;  %p689_p11 = scmp.lt.s32.totalorder %s519_s13, %s519_s13 }
 0x4a3   :  { %p685_p10 = scmp.ne.s32.totalorder %s519_s13, %s684_s14  ;;  %p690_p12 = scmp.lt.s32.totalorder %s684_s14, %s684_s14 }
 0x4a5   :  { %p691_p13 = por %p690_p12, %p689_p11 }
 0x4a7   :  { %p692_p0 = pnand %p691_p13, %p685_p10 }
 0x562   :  { %v431_v60 = vpop.f32.mrb[0].mxu1 }
 0x563   :  { %v574_v61 = vpop.f32.mrb[1].mxu1 }
 0x564   :  { %v434_v3 = vpop.f32.mrb[2].mxu1 }
 0x565   :  { %v575_v4 = vpop.f32.mrb[3].mxu1 }
 0x56a   :  { %v499_v5 = vpop.f32.mrb[4].mxu1 }
 0x56b   :  { %v507_v6 = vrot.slane %v499_v5, 7  ;;  %v580_v7 = vpop.f32.mrb[5].mxu1 }
 0x56c   :  { %v502_v8 = vpop.f32.mrb[6].mxu1 }
 0x56d   :  { %v581_v9 = vpop.f32.mrb[7].mxu1  ;;  %v508_v10 = vsel %vm276_vm2, %v507_v6, %v431_v60 }
 0x56e   :  { %511 = vst.msk [vmem:[#allocation7] sm:$0x3] %vm510_vm6, %v508_v10 }
 0x56f   :  { %695 = shalt.err (!%p692_p0)
}
 0x570   :  { %s696_s16 = scalar_lea.hbm %s878_s5, 32 }
 0x571   :  { %p697_p1 = scmp.ne.s32.totalorder %s878_s5, %s696_s16  ;;  %p700_p2 = scmp.lt.u32.totalorder %s696_s16, %s878_s5 }
 0x573   :  { %p702_p3 = pnand %p700_p2, %p697_p1 }
 0x575   :  { %705 = shalt.err (!%p702_p3)
}
 0x576   :  { %521 = dma.vmem_to_hbm [thread:$0]  %s519_s13, 32, %s878_s5, [#allocation4]  }
 0x577   :  { %710 = dma.done.wait [#allocation4], 32  }
 0x578   :  { %711 = vsyncadd [#allocation4], 4294967264 }
 0x579   :  { %712 = dma.done.wait [#allocation9], 32  }
 0x57a   :  { %713 = vsyncadd [#allocation9], 4294967264 }
 0x57b   :  { %538 = vsyncpa [#allocation3], 1 }
 0x57c   :  { %539 = vsyncpa [#allocation6], 1 }
 0x57d   :  { %540 = vsyncpa [#allocation4], 1 }
 0x57e   :  { %541 = vsyncpa [#allocation9], 1 }

</bundles_post_ra>
